<compile_context>
chip_gen: v7x
topology: tpu7x:2x2x1
jax: 0.10.0
libtpu: 0.0.40
codegen_flags: <defaults>
</compile_context>

<pallas_src>
import jax
import jax.numpy as jnp
from jax.experimental import pallas as pl
from jax.experimental.pallas import tpu as pltpu

BN_EPS = 1e-5
LEAKY_SLOPE = 0.01  # F.leaky_relu default negative_slope


def decoder_kernel(z_ref, w1_ref, b1_ref, gamma_ref, beta_ref,
                   w2_ref, b2_ref, out_ref, h_ref):
    # ---- fc1 + BatchNorm1d (training-mode batch stats) + LeakyReLU ---------
    # Computed once (first grid step) into a persistent bf16 VMEM scratch.
    @pl.when(pl.program_id(0) == 0)
    def _():
        h = jnp.dot(z_ref[...].astype(jnp.bfloat16), w1_ref[...],
                    preferred_element_type=jnp.float32) + b1_ref[...]
        mean = jnp.mean(h, axis=0, keepdims=True)
        centered = h - mean
        var = jnp.mean(centered * centered, axis=0, keepdims=True)  # biased var
        scale = gamma_ref[...] * jax.lax.rsqrt(var + BN_EPS)        # EUP rsqrt
        shift = beta_ref[...] - mean * scale
        h_bn = h * scale + shift                                    # fused affine
        h_act = jnp.maximum(h_bn, LEAKY_SLOPE * h_bn)               # LeakyReLU
        h_ref[...] = h_act.astype(jnp.bfloat16)

    # ---- fc2 tile: (B, H) @ (H, TN) in bf16 operands, f32 accumulate -------
    out = jnp.dot(h_ref[...], w2_ref[...],
                  preferred_element_type=jnp.float32) + b2_ref[...]
    out_ref[...] = out.astype(out_ref.dtype)


def _pick_tn(G, B, H, out_bytes, *, preferred=2048, vmem_budget=24 << 20):
    """Lane-dense gene tile, sized against a VMEM budget.

    Per-tile VMEM (double-buffered streams): output (B*tn*out_bytes) +
    W2 tile (H*tn*2) + b2 tile (tn*4), each x2 buffers.  Resident state
    (z, W1, b1/gamma/beta, h scratch) is negligible by comparison.
    """
    g128 = ((G + 127) // 128) * 128
    tn = min(preferred, g128)
    cost = lambda t: 2 * t * (B * out_bytes + H * 2 + 4)
    while tn > 128 and cost(tn) > vmem_budget:
        tn //= 2
    return max(128, tn)


def persist_bf16_weights(w1, b1, gamma, beta, w2, b2):
    """One-time cast of the matmul weights to bf16.

    Do this OUTSIDE the hot loop (at init / parameter-load time) so the
    per-call forward pass never pays an HBM round trip just to re-cast W2.
    BN / bias parameters stay f32 (elementwise math runs in f32).
    """
    return (w1.astype(jnp.bfloat16), b1, gamma, beta,
            w2.astype(jnp.bfloat16), b2)


def decoder_forward(z, w1, b1, gamma, beta, w2, b2, *,
                    tn=None, out_dtype=jnp.float32):
    B, L = z.shape
    H, G = w2.shape
    assert w1.shape == (L, H)

    # Weights should already be bf16 (persist_bf16_weights); the casts below
    # are a fallback only and are no-ops on the intended hot path.
    if w1.dtype != jnp.bfloat16:
        w1 = w1.astype(jnp.bfloat16)
    if w2.dtype != jnp.bfloat16:
        w2 = w2.astype(jnp.bfloat16)

    if tn is None:
        tn = _pick_tn(G, B, H, jnp.dtype(out_dtype).itemsize)
    grid = (pl.cdiv(G, tn),)   # ragged tail: last block is masked on store

    const = lambda shape: pl.BlockSpec(shape, lambda j: (0, 0))

    return pl.pallas_call(
        decoder_kernel,
        out_shape=jax.ShapeDtypeStruct((B, G), out_dtype),
        grid=grid,
        in_specs=[
            const((B, L)),                              # z        (resident, f32)
            const((L, H)),                              # W1       (resident, bf16)
            const((1, H)),                              # b1       (resident)
            const((1, H)),                              # gamma    (resident)
            const((1, H)),                              # beta     (resident)
            pl.BlockSpec((H, tn), lambda j: (0, j)),    # W2 tile  (streamed, bf16)
            pl.BlockSpec((1, tn), lambda j: (0, j)),    # b2 tile  (streamed)
        ],
        out_specs=pl.BlockSpec((B, tn), lambda j: (0, j)),
        scratch_shapes=[pltpu.VMEM((B, H), jnp.bfloat16)],   # persistent h_act
        compiler_params=pltpu.CompilerParams(
            # Scratch carries h_act across grid steps -> reduction-style axis.
            # ("parallel" would break the hoist on v7x's 2 TCs; the kernel is
            # HBM-bound on the W2 stream, so the megacore split buys ~nothing.)
            dimension_semantics=("arbitrary",),
            vmem_limit_bytes=32 * 1024 * 1024,
        ),
    )(z, w1, b1, gamma, beta, w2, b2)


def init_params(key, latent_size, gene_num, hidden_dim):
    """Deterministic f32 init matching initialize_weights_xavier semantics."""
    k1, k2 = jax.random.split(key, 2)
    # xavier_normal_: std = sqrt(2 / (fan_in + fan_out))
    std1 = (2.0 / (latent_size + hidden_dim)) ** 0.5
    std2 = (2.0 / (hidden_dim + gene_num)) ** 0.5
    # stored transposed vs torch: (in, out)
    w1 = jax.random.normal(k1, (latent_size, hidden_dim), jnp.float32) * std1
    w2 = jax.random.normal(k2, (hidden_dim, gene_num), jnp.float32) * std2
    b1 = jnp.zeros((1, hidden_dim), jnp.float32)
    b2 = jnp.zeros((1, gene_num), jnp.float32)
    gamma = jnp.ones((1, hidden_dim), jnp.float32)   # BatchNorm1d weight = 1
    beta = jnp.zeros((1, hidden_dim), jnp.float32)   # BatchNorm1d bias = 0
    return w1, b1, gamma, beta, w2, b2


def reference_forward_f32(z, w1, b1, gamma, beta, w2, b2):
    """Pure-f32 reference matching the PyTorch module semantics."""
    h = z @ w1 + b1
    mean = h.mean(axis=0, keepdims=True)
    var = ((h - mean) ** 2).mean(axis=0, keepdims=True)
    h = (h - mean) / jnp.sqrt(var + BN_EPS) * gamma + beta
    h = jnp.where(h >= 0, h, LEAKY_SLOPE * h)
    return h @ w2 + b2


def reference_forward_matched(z, w1, b1, gamma, beta, w2, b2):
    """Reference using the same bf16-operand / f32-accumulate arithmetic."""
    h = jnp.dot(z.astype(jnp.bfloat16), w1.astype(jnp.bfloat16),
                preferred_element_type=jnp.float32) + b1
    mean = h.mean(axis=0, keepdims=True)
    centered = h - mean
    var = (centered * centered).mean(axis=0, keepdims=True)
    scale = gamma * jax.lax.rsqrt(var + BN_EPS)
    shift = beta - mean * scale
    h = h * scale + shift
    h = jnp.maximum(h, LEAKY_SLOPE * h)
    return jnp.dot(h.astype(jnp.bfloat16), w2.astype(jnp.bfloat16),
                   preferred_element_type=jnp.float32) + b2


if __name__ == "__main__":
    # Ragged gene_num (not a multiple of 128) exercises the cdiv tail path.
    latent_size, gene_num, hidden_dim = 16, 1000, 128
    batch = 8   # NOTE: at B=8 the kernel is HBM-bound on the W2 stream; batch
                # toward 128+ rows to approach the MXU roofline.

    key = jax.random.PRNGKey(0)
    kz, kp = jax.random.split(key)
    z = jax.random.normal(kz, (batch, latent_size), jnp.float32)
    params_f32 = init_params(kp, latent_size, gene_num, hidden_dim)

    # One-time bf16 weight persistence -- OUTSIDE the hot loop.
    params = persist_bf16_weights(*params_f32)

    # tn=512 forces a 2-step grid (512 + masked 488) to exercise pipelining
    # and the ragged tail at this small demo size; leave tn=None in real use.
    fwd = jax.jit(lambda z_, p: decoder_forward(z_, *p, tn=512))
    out = jax.block_until_ready(fwd(z, params))
    assert out.shape == (batch, gene_num)

    # Exact-arithmetic check against a bf16-matched reference.
    ref_m = reference_forward_matched(z, *params_f32)
    assert jnp.allclose(out, ref_m, atol=5e-3, rtol=5e-3), \
        float(jnp.max(jnp.abs(out - ref_m)))

    # Semantic check against the full-f32 module reference (bf16 tolerance).
    ref_f = reference_forward_f32(z, *params_f32)
    assert jnp.allclose(out, ref_f, atol=5e-2, rtol=5e-2), \
        float(jnp.max(jnp.abs(out - ref_f)))

    print("KERNEL_OK")
</pallas_src>

<mosaic_0001>
module attributes {stable_mosaic.version = 11 : i64} {
  func.func @decoder_kernel(%arg0: i32, %arg1: memref<8x16xf32, #tpu.memory_space<vmem>>, %arg2: memref<16x128xbf16, #tpu.memory_space<vmem>>, %arg3: memref<1x128xf32, #tpu.memory_space<vmem>>, %arg4: memref<1x128xf32, #tpu.memory_space<vmem>>, %arg5: memref<1x128xf32, #tpu.memory_space<vmem>>, %arg6: memref<128x512xbf16, #tpu.memory_space<vmem>>, %arg7: memref<1x512xf32, #tpu.memory_space<vmem>>, %arg8: memref<8x512xf32, #tpu.memory_space<vmem>>, %arg9: memref<8x128xbf16, #tpu.memory_space<vmem>>) attributes {dimension_semantics = [#tpu.dimension_semantics<arbitrary>], iteration_bounds = array<i64: 2>, scalar_prefetch = 0 : i64, scratch_operands = 1 : i64, tpu.core_type = #tpu.core_type<tc>, window_params = [{pipeline_mode = #tpu.pipeline_mode<synchronous>, transform_indices = @transform_0, window_bounds = array<i64: 8, 16>}, {pipeline_mode = #tpu.pipeline_mode<synchronous>, transform_indices = @transform_1, window_bounds = array<i64: 16, 128>}, {pipeline_mode = #tpu.pipeline_mode<synchronous>, transform_indices = @transform_2, window_bounds = array<i64: 1, 128>}, {pipeline_mode = #tpu.pipeline_mode<synchronous>, transform_indices = @transform_3, window_bounds = array<i64: 1, 128>}, {pipeline_mode = #tpu.pipeline_mode<synchronous>, transform_indices = @transform_4, window_bounds = array<i64: 1, 128>}, {transform_indices = @transform_5, window_bounds = array<i64: 128, 512>}, {transform_indices = @transform_6, window_bounds = array<i64: 1, 512>}, {transform_indices = @transform_7, window_bounds = array<i64: 8, 512>}]} {
    %c0_i32 = arith.constant 0 : i32
    %0 = arith.cmpi eq, %arg0, %c0_i32 : i32
    %1 = arith.extui %0 : i1 to i32
    %c0_i32_0 = arith.constant 0 : i32
    %2 = arith.cmpi ne, %1, %c0_i32_0 : i32
    scf.if %2 {
      %c0_8 = arith.constant 0 : index
      %c0_9 = arith.constant 0 : index
      %10 = vector.load %arg1[%c0_8, %c0_9] : memref<8x16xf32, #tpu.memory_space<vmem>>, vector<8x16xf32>
      %11 = arith.truncf %10 : vector<8x16xf32> to vector<8x16xbf16>
      %c0_10 = arith.constant 0 : index
      %c0_11 = arith.constant 0 : index
      %12 = vector.load %arg2[%c0_10, %c0_11] : memref<16x128xbf16, #tpu.memory_space<vmem>>, vector<16x128xbf16>
      %cst_12 = arith.constant dense<0.000000e+00> : vector<8x128xf32>
      %13 = tpu.matmul %11, %12, %cst_12 {dimension_numbers = #tpu.dot_dimension_numbers<[1], [0], [0], [1], [0, 0, 1, 1], [], []>} : vector<8x16xbf16>, vector<16x128xbf16>, vector<8x128xf32> -> vector<8x128xf32>
      %c0_13 = arith.constant 0 : index
      %c0_14 = arith.constant 0 : index
      %14 = vector.load %arg3[%c0_13, %c0_14] : memref<1x128xf32, #tpu.memory_space<vmem>>, vector<1x128xf32>
      %15 = vector.broadcast %14 : vector<1x128xf32> to vector<8x128xf32>
      %16 = arith.addf %13, %15 : vector<8x128xf32>
      %cst_15 = arith.constant dense<0.000000e+00> : vector<128xf32>
      %17 = vector.multi_reduction <add>, %16, %cst_15 [0] : vector<8x128xf32> to vector<128xf32>
      %18 = vector.shape_cast %17 : vector<128xf32> to vector<1x128xf32>
      %cst_16 = arith.constant 8.000000e+00 : f32
      %19 = vector.broadcast %cst_16 : f32 to vector<1x128xf32>
      %20 = arith.divf %18, %19 : vector<1x128xf32>
      %21 = vector.broadcast %20 : vector<1x128xf32> to vector<8x128xf32>
      %22 = arith.subf %16, %21 : vector<8x128xf32>
      %23 = arith.mulf %22, %22 : vector<8x128xf32>
      %cst_17 = arith.constant dense<0.000000e+00> : vector<128xf32>
      %24 = vector.multi_reduction <add>, %23, %cst_17 [0] : vector<8x128xf32> to vector<128xf32>
      %25 = vector.shape_cast %24 : vector<128xf32> to vector<1x128xf32>
      %cst_18 = arith.constant 8.000000e+00 : f32
      %26 = vector.broadcast %cst_18 : f32 to vector<1x128xf32>
      %27 = arith.divf %25, %26 : vector<1x128xf32>
      %c0_19 = arith.constant 0 : index
      %c0_20 = arith.constant 0 : index
      %28 = vector.load %arg4[%c0_19, %c0_20] : memref<1x128xf32, #tpu.memory_space<vmem>>, vector<1x128xf32>
      %cst_21 = arith.constant 9.99999974E-6 : f32
      %29 = vector.broadcast %cst_21 : f32 to vector<1x128xf32>
      %30 = arith.addf %27, %29 : vector<1x128xf32>
      %31 = math.rsqrt %30 : vector<1x128xf32>
      %32 = arith.mulf %28, %31 : vector<1x128xf32>
      %c0_22 = arith.constant 0 : index
      %c0_23 = arith.constant 0 : index
      %33 = vector.load %arg5[%c0_22, %c0_23] : memref<1x128xf32, #tpu.memory_space<vmem>>, vector<1x128xf32>
      %34 = arith.mulf %20, %32 : vector<1x128xf32>
      %35 = arith.subf %33, %34 : vector<1x128xf32>
      %36 = vector.broadcast %32 : vector<1x128xf32> to vector<8x128xf32>
      %37 = arith.mulf %16, %36 : vector<8x128xf32>
      %38 = vector.broadcast %35 : vector<1x128xf32> to vector<8x128xf32>
      %39 = arith.addf %37, %38 : vector<8x128xf32>
      %cst_24 = arith.constant 0.00999999977 : f32
      %40 = vector.broadcast %cst_24 : f32 to vector<8x128xf32>
      %41 = arith.mulf %40, %39 : vector<8x128xf32>
      %42 = arith.maximumf %39, %41 : vector<8x128xf32>
      %43 = arith.truncf %42 : vector<8x128xf32> to vector<8x128xbf16>
      %c0_25 = arith.constant 0 : index
      %c0_26 = arith.constant 0 : index
      %44 = vector.load %arg9[%c0_25, %c0_26] : memref<8x128xbf16, #tpu.memory_space<vmem>>, vector<8x128xbf16>
      tpu.vector_store %arg9[%c0_25, %c0_26], %43 {strides = array<i32>} : memref<8x128xbf16, #tpu.memory_space<vmem>>, vector<8x128xbf16>,
    } else {
    }
    %c0 = arith.constant 0 : index
    %c0_1 = arith.constant 0 : index
    %3 = vector.load %arg9[%c0, %c0_1] : memref<8x128xbf16, #tpu.memory_space<vmem>>, vector<8x128xbf16>
    %c0_2 = arith.constant 0 : index
    %c0_3 = arith.constant 0 : index
    %4 = vector.load %arg6[%c0_2, %c0_3] : memref<128x512xbf16, #tpu.memory_space<vmem>>, vector<128x512xbf16>
    %cst = arith.constant dense<0.000000e+00> : vector<8x512xf32>
    %5 = tpu.matmul %3, %4, %cst {dimension_numbers = #tpu.dot_dimension_numbers<[1], [0], [0], [1], [0, 0, 1, 1], [], []>} : vector<8x128xbf16>, vector<128x512xbf16>, vector<8x512xf32> -> vector<8x512xf32>
    %c0_4 = arith.constant 0 : index
    %c0_5 = arith.constant 0 : index
    %6 = vector.load %arg7[%c0_4, %c0_5] : memref<1x512xf32, #tpu.memory_space<vmem>>, vector<1x512xf32>
    %7 = vector.broadcast %6 : vector<1x512xf32> to vector<8x512xf32>
    %8 = arith.addf %5, %7 : vector<8x512xf32>
    %c0_6 = arith.constant 0 : index
    %c0_7 = arith.constant 0 : index
    %9 = vector.load %arg8[%c0_6, %c0_7] : memref<8x512xf32, #tpu.memory_space<vmem>>, vector<8x512xf32>
    tpu.vector_store %arg8[%c0_6, %c0_7], %8 {strides = array<i32>} : memref<8x512xf32, #tpu.memory_space<vmem>>, vector<8x512xf32>,
    return
  }
  func.func @transform_0(%arg0: i32) -> (i32, i32) {
    %c0_i32 = arith.constant 0 : i32
    %c0_i32_0 = arith.constant 0 : i32
    %c0_i32_1 = arith.constant 0 : i32
    return %c0_i32, %c0_i32_0 : i32, i32
  }
  func.func @transform_1(%arg0: i32) -> (i32, i32) {
    %c0_i32 = arith.constant 0 : i32
    %c0_i32_0 = arith.constant 0 : i32
    %c0_i32_1 = arith.constant 0 : i32
    return %c0_i32, %c0_i32_0 : i32, i32
  }
  func.func @transform_2(%arg0: i32) -> (i32, i32) {
    %c0_i32 = arith.constant 0 : i32
    %c0_i32_0 = arith.constant 0 : i32
    %c0_i32_1 = arith.constant 0 : i32
    return %c0_i32, %c0_i32_0 : i32, i32
  }
  func.func @transform_3(%arg0: i32) -> (i32, i32) {
    %c0_i32 = arith.constant 0 : i32
    %c0_i32_0 = arith.constant 0 : i32
    %c0_i32_1 = arith.constant 0 : i32
    return %c0_i32, %c0_i32_0 : i32, i32
  }
  func.func @transform_4(%arg0: i32) -> (i32, i32) {
    %c0_i32 = arith.constant 0 : i32
    %c0_i32_0 = arith.constant 0 : i32
    %c0_i32_1 = arith.constant 0 : i32
    return %c0_i32, %c0_i32_0 : i32, i32
  }
  func.func @transform_5(%arg0: i32) -> (i32, i32) {
    %c0_i32 = arith.constant 0 : i32
    %c0_i32_0 = arith.constant 0 : i32
    return %c0_i32, %arg0 : i32, i32
  }
  func.func @transform_6(%arg0: i32) -> (i32, i32) {
    %c0_i32 = arith.constant 0 : i32
    %c0_i32_0 = arith.constant 0 : i32
    return %c0_i32, %arg0 : i32, i32
  }
  func.func @transform_7(%arg0: i32) -> (i32, i32) {
    %c0_i32 = arith.constant 0 : i32
    %c0_i32_0 = arith.constant 0 : i32
    return %c0_i32, %arg0 : i32, i32
  }
}

</mosaic_0001>

<bundles_post_ra>
// kernel: _lambda_.1
= control target key start
LH: loop header
LB: loop body
LE: loop exit
PB: predicated region body
PF: predicated region fallthrough
CT: control target
= control target key end

     0   :  { %12 = vsyncpa [#allocation5], 0  ;;  %s1387_s0 = inlined_call_operand.vmem [shape: f32[8,16], index: 0, kind: input, shape index: {}]   ;;  %s1388_s1 = inlined_call_operand.vmem [shape: bf16[16,128], index: 1, kind: input, shape index: {}]   ;;  %s1389_s2 = inlined_call_operand.vmem [shape: f32[1,128], index: 2, kind: input, shape index: {}]   ;;  %s1390_s3 = inlined_call_operand.vmem [shape: f32[1,128], index: 3, kind: input, shape index: {}]   ;;  %s1391_s4 = inlined_call_operand.vmem [shape: f32[1,128], index: 4, kind: input, shape index: {}]   ;;  %s1392_s5 = inlined_call_operand.vmem [shape: bf16[128,1000], index: 5, kind: input, shape index: {}]   ;;  %s1393_s6 = inlined_call_operand.vmem [shape: f32[1,1000], index: 6, kind: input, shape index: {}]   ;;  %s1394_s7 = inlined_call_operand.hbm [shape: f32[8,1000], index: 7, kind: output, shape index: {}]  }
   0x1   :  { %14 = vsyncpa [#allocation5 + $0x1], 0  ;;  %s1140_s24 = smov 0   ;;  %s1142_s25 = smov 0  }
   0x2   :  { %s1144_s26 = smov 0   ;;  %s1146_s27 = smov 0  }
   0x3 LB: > { %s1161_s28 = sadd.s32 4294967295, %s1094_s27   ;;  %s878_s29 = sadd.s32 4294967294, %s1094_s27   ;;  %s1094_s27 = sphi %s1146_s27, %s1400_s27   ;;  %s1090_s26 = sphi %s1144_s26, %s1399_s26   ;;  %s1086_s25 = sphi %s1142_s25, %s1398_s25   ;;  %s1082_s24 = sphi %s1140_s24, %s1397_s24  }
   0x4   : > { %s1165_s30 = sadd.s32 1, %s1094_s27   ;;  %s132_s8 = sadd.s32 1, %s1090_s26 }
   0x5   : > { %s129_s9 = ssub.s32 %s1094_s27, %s1165_s30  ;;  %p139_p0 = scmp.ne.s32.totalorder %s1090_s26, %s1086_s25 }
   0x6   : > { %p130_p1 = scmp.eq.s32.totalorder %s129_s9, 0  ;;  %p140_p2 = scmp.eq.s32.totalorder %s1094_s27, 0 }
   0x7   : > { %p195_p3 = scmp.eq.s32.totalorder %s1161_s28, 1  ;;  %p200_p4 = scmp.ne.s32.totalorder %s1086_s25, %s1082_s24 }
   0x8   : > { %s1177_s10 = scalar_select %p130_p1, %s1090_s26, %s132_s8  }
   0x9   : > { %p141_p5 = por %p140_p2, %p139_p0  ;;  %p1179_p6 = por %p195_p3, %p139_p0 }
   0xa   : > { %p201_p7 = scmp.eq.s32.totalorder %s878_s29, 1  ;;  %p880_p9 = scmp.ge.s32.totalorder %s1094_s27, 2 }
   0xc   : > { %p1183_p8 = por %p201_p7, %p200_p4  ;;  %232 = sbr.rel (%p880_p9) target bundleno = 39 (0x27), region = 36 }
  0x13   : > { %235 = sbr.rel (!%p141_p5) target bundleno = 39 (0x27), region = 40  ;;  %s237_s13 = sand.u32 (%p141_p5), 1, %s1090_s26  }
  0x14   : > { %s929_s14 = sshll.u32 (%p141_p5), %s1094_s27, 4  ;;  %s881_s15 = sshll.u32 (%p141_p5), %s237_s13, 8 }
  0x15   : > { %s1195_s18 = scalar_lea.vmem (%p141_p5), %s1392_s5, %s929_s14  ;;  %s1200_s19 = scalar_lea.vmem (%p141_p5), [#allocation3], %s881_s15 }
  0x16   : > { %v255_v0 = vld [vmem:[%s1195_s18] sm:$0xff] (%p141_p5)  ;;  %v257_v1 = vld [vmem:[%s1195_s18 + $0x8] sm:$0xff] (%p141_p5) }
  0x17   : > { %v259_v2 = vld [vmem:[%s1195_s18 + $0x20] sm:$0xff] (%p141_p5)  ;;  %256 = vst [vmem:[%s1200_s19] sm:$0xff] (%p141_p5), %v255_v0  ;;  %258 = vst [vmem:[%s1200_s19 + $0x8] sm:$0xff] (%p141_p5), %v257_v1  ;;  %v261_v3 = vld [vmem:[%s1195_s18 + $0x28] sm:$0xff] (%p141_p5) }
  0x18   : > { %260 = vst [vmem:[%s1200_s19 + $0x10] sm:$0xff] (%p141_p5), %v259_v2  ;;  %v263_v4 = vld [vmem:[%s1195_s18 + $0x40] sm:$0xff] (%p141_p5)  ;;  %v265_v5 = vld [vmem:[%s1195_s18 + $0x48] sm:$0xff] (%p141_p5)  ;;  %262 = vst [vmem:[%s1200_s19 + $0x18] sm:$0xff] (%p141_p5), %v261_v3 }
  0x19   : > { %264 = vst [vmem:[%s1200_s19 + $0x20] sm:$0xff] (%p141_p5), %v263_v4  ;;  %266 = vst [vmem:[%s1200_s19 + $0x28] sm:$0xff] (%p141_p5), %v265_v5  ;;  %v267_v6 = vld [vmem:[%s1195_s18 + $0x60] sm:$0xff] (%p141_p5)  ;;  %v269_v7 = vld [vmem:[%s1195_s18 + $0x68] sm:$0xff] (%p141_p5) }
  0x1a   : > { %v271_v8 = vld [vmem:[%s1195_s18 + $0x80] sm:$0xff]  ;;  %268 = vst [vmem:[%s1200_s19 + $0x30] sm:$0xff] %v267_v6  ;;  %270 = vst [vmem:[%s1200_s19 + $0x38] sm:$0xff] %v269_v7  ;;  %v273_v9 = vld [vmem:[%s1195_s18 + $0x88] sm:$0xff] }
  0x1b   : > { %272 = vst [vmem:[%s1200_s19 + $0x40] sm:$0xff] %v271_v8  ;;  %v275_v10 = vld [vmem:[%s1195_s18 + $0xa0] sm:$0xff]  ;;  %v277_v11 = vld [vmem:[%s1195_s18 + $0xa8] sm:$0xff]  ;;  %274 = vst [vmem:[%s1200_s19 + $0x48] sm:$0xff] %v273_v9 }
  0x1c   : > { %276 = vst [vmem:[%s1200_s19 + $0x50] sm:$0xff] %v275_v10  ;;  %278 = vst [vmem:[%s1200_s19 + $0x58] sm:$0xff] %v277_v11  ;;  %v279_v12 = vld [vmem:[%s1195_s18 + $0xc0] sm:$0xff]  ;;  %v281_v13 = vld [vmem:[%s1195_s18 + $0xc8] sm:$0xff] }
  0x1d   : > { %v283_v14 = vld [vmem:[%s1195_s18 + $0xe0] sm:$0xff]  ;;  %280 = vst [vmem:[%s1200_s19 + $0x60] sm:$0xff] %v279_v12  ;;  %282 = vst [vmem:[%s1200_s19 + $0x68] sm:$0xff] %v281_v13  ;;  %v285_v15 = vld [vmem:[%s1195_s18 + $0xe8] sm:$0xff] }
  0x1e   : > { %284 = vst [vmem:[%s1200_s19 + $0x70] sm:$0xff] %v283_v14  ;;  %v287_v16 = vld [vmem:[%s1195_s18 + $0x100] sm:$0xff]  ;;  %v289_v17 = vld [vmem:[%s1195_s18 + $0x108] sm:$0xff]  ;;  %286 = vst [vmem:[%s1200_s19 + $0x78] sm:$0xff] %v285_v15 }
  0x1f   : > { %288 = vst [vmem:[%s1200_s19 + $0x80] sm:$0xff] %v287_v16  ;;  %290 = vst [vmem:[%s1200_s19 + $0x88] sm:$0xff] %v289_v17  ;;  %v291_v18 = vld [vmem:[%s1195_s18 + $0x120] sm:$0xff]  ;;  %v293_v19 = vld [vmem:[%s1195_s18 + $0x128] sm:$0xff] }
  0x20   : > { %v295_v20 = vld [vmem:[%s1195_s18 + $0x140] sm:$0xff]  ;;  %292 = vst [vmem:[%s1200_s19 + $0x90] sm:$0xff] %v291_v18  ;;  %294 = vst [vmem:[%s1200_s19 + $0x98] sm:$0xff] %v293_v19  ;;  %v297_v21 = vld [vmem:[%s1195_s18 + $0x148] sm:$0xff] }
  0x21   : > { %296 = vst [vmem:[%s1200_s19 + $0xa0] sm:$0xff] %v295_v20  ;;  %v299_v22 = vld [vmem:[%s1195_s18 + $0x160] sm:$0xff]  ;;  %v301_v23 = vld [vmem:[%s1195_s18 + $0x168] sm:$0xff]  ;;  %298 = vst [vmem:[%s1200_s19 + $0xa8] sm:$0xff] %v297_v21 }
  0x22   : > { %300 = vst [vmem:[%s1200_s19 + $0xb0] sm:$0xff] %v299_v22  ;;  %302 = vst [vmem:[%s1200_s19 + $0xb8] sm:$0xff] %v301_v23  ;;  %v303_v24 = vld [vmem:[%s1195_s18 + $0x180] sm:$0xff]  ;;  %v305_v25 = vld [vmem:[%s1195_s18 + $0x188] sm:$0xff] }
  0x23   : > { %v307_v26 = vld [vmem:[%s1195_s18 + $0x1a0] sm:$0xff]  ;;  %304 = vst [vmem:[%s1200_s19 + $0xc0] sm:$0xff] %v303_v24  ;;  %306 = vst [vmem:[%s1200_s19 + $0xc8] sm:$0xff] %v305_v25  ;;  %v309_v27 = vld [vmem:[%s1195_s18 + $0x1a8] sm:$0xff] }
  0x24   : > { %308 = vst [vmem:[%s1200_s19 + $0xd0] sm:$0xff] %v307_v26  ;;  %v311_v28 = vld [vmem:[%s1195_s18 + $0x1c0] sm:$0xff]  ;;  %v313_v29 = vld [vmem:[%s1195_s18 + $0x1c8] sm:$0xff]  ;;  %310 = vst [vmem:[%s1200_s19 + $0xd8] sm:$0xff] %v309_v27 }
  0x25   : > { %312 = vst [vmem:[%s1200_s19 + $0xe0] sm:$0xff] %v311_v28  ;;  %314 = vst [vmem:[%s1200_s19 + $0xe8] sm:$0xff] %v313_v29  ;;  %v315_v30 = vld [vmem:[%s1195_s18 + $0x1e0] sm:$0xff]  ;;  %v317_v31 = vld [vmem:[%s1195_s18 + $0x1e8] sm:$0xff] }
  0x26   : > { %316 = vst [vmem:[%s1200_s19 + $0xf0] sm:$0xff] %v315_v30  ;;  %318 = vst [vmem:[%s1200_s19 + $0xf8] sm:$0xff] %v317_v31 }
  0x27 PF: > { %p884_p10 = scmp.ge.s32.totalorder %s1094_s27, 1  ;;  %p331_p11 = scmp.lt.s32.totalorder %s1094_s27, 3 }
  0x29   : > { %p332_p12 = pnand %p884_p10, %p331_p11 }
  0x2a   : > { %s1266_s20 = sand.u32 (!%p332_p12), 1, %s1086_s25   ;;  %s887_s21 = sshll.u32 (!%p332_p12), %s1161_s28, 2 }
  0x2b   : > { %335 = sbr.rel (%p332_p12) target bundleno = 595 (0x253), region = 67  ;;  %s885_s22 = sshll.u32 (!%p332_p12), %s1266_s20, 8 }
  0x2c   : > { %s886_s23 = sshll.u32 (!%p332_p12), %s1266_s20, 5  ;;  %p375_p13 = scmp.lt.s32.totalorder (!%p332_p12), %s887_s21, 7 }
  0x2d   : > { %s1277_s13 = scalar_lea.vmem (!%p332_p12), [#allocation3], %s885_s22  ;;  %s1279_s14 = scalar_lea.vmem (!%p332_p12), [#allocation4], %s886_s23 }
  0x2e   : > { %p888_p0 = scmp.ne.s32.totalorder (!%p332_p12), %s1161_s28, 0 }
  0x32   : > { %s1402_s21 = smov (!%p375_p13, %s887_s21), 7  ;;  %384 = sbr.rel (%p888_p0) target bundleno = 332 (0x14c), region = 75 }
  0x33   : > { %s377_s9 = scalar_lea.vmem %s1393_s6, %s1402_s21  ;;  %v981_v32 = vld [vmem:[%s1388_s1] sm:$0xff] (!%p888_p0)   ;;  %v1096_v33 = vmov (!%p888_p0), 0.0   ;;  %vm1097_vm0 = vmmov (!%p888_p0), 0   ;;  %vm402_vm1 = vcmask (!%p888_p0), 130048   ;;  %v471_v59 = vlaneseq (!%p888_p0) }
  0x34   : > { %933 = vmatprep.subr.bf16.mxu0 (!%p888_p0), %v1096_v33  ;;  %v385_v34 = vld [vmem:[%s1387_s0] sm:$0xff] (!%p888_p0)  ;;  %935 = vmatprep.mubr.msk.bf16.mxu0 (!%p888_p0), %vm1097_vm0, %v1096_v33 }
  0x35   : > { %934 = vmatpush3.bf16.msra.mxu0 (!%p888_p0), %v981_v32  ;;  %v386_v35 = vpack.c.bf16 (!%p888_p0), %v385_v34, %v385_v34  ;;  %v889_v36 = vld [vmem:[%s1389_s2] ss:$0 sm:$0xff] (!%p888_p0)  ;;  %v472_v60 = vshrl.u32 (!%p888_p0), %v471_v59, 7 }
  0x36   : > { %v463_v61 = vld [vmem:[%s1390_s3] sm:$0x1] (!%p888_p0) }
  0x37   : > { %v473_v62 = vsub.s32 (!%p888_p0), 0, %v472_v60  ;;  %v467_v1 = vld [vmem:[%s1391_s4] sm:$0x1] (!%p888_p0) }
  0x38   : > { %936 = vmatmul.mubr.msk.bf16.vlgmr.msra.gmra.mrb[0].mxu0 (!%p888_p0), %vm402_vm1, %v386_v35 }
 0x10b   : > { %v440_v37 = vpop.f32.mrb[0].mxu0 }
 0x10c   : > { %v441_v38 = vadd.f32 %v889_v36, %v440_v37  ;;  %v937_v39 = vpop.f32.mrb[1].mxu0 }
 0x10d   : > { %v443_v40 = vpop.f32.mrb[2].mxu0 }
 0x10e   : > { %v446_v41 = vrot.slane %v441_v38, 4  ;;  %v938_v42 = vpop.f32.mrb[3].mxu0 }
 0x110   : > { %v447_v43 = vadd.f32 %v446_v41, %v441_v38 }
 0x112   : > { %v448_v44 = vrot.slane %v447_v43, 2 }
 0x114   : > { %v449_v45 = vadd.f32 %v448_v44, %v447_v43 }
 0x116   : > { %v450_v46 = vrot.slane %v449_v45, 1 }
 0x118   : > { %v451_v47 = vadd.f32 %v450_v46, %v449_v45 }
 0x11a   : > { %v453_v48 = vmul.f32 0.125, %v451_v47 }
 0x11c   : > { %v454_v49 = vsub.f32 %v441_v38, %v453_v48 }
 0x11e   : > { %v455_v50 = vmul.f32 %v454_v49, %v454_v49 }
 0x120   : > { %v456_v51 = vrot.slane %v455_v50, 4 }
 0x122   : > { %v457_v52 = vadd.f32 %v456_v51, %v455_v50 }
 0x124   : > { %v458_v53 = vrot.slane %v457_v52, 2 }
 0x126   : > { %v459_v54 = vadd.f32 %v458_v53, %v457_v52 }
 0x128   : > { %v460_v55 = vrot.slane %v459_v54, 1 }
 0x12a   : > { %v461_v56 = vadd.f32 %v460_v55, %v459_v54 }
 0x12c   : > { %v462_v57 = vmul.f32 0.125, %v461_v56 }
 0x12e   : > { %v464_v58 = vadd.f32 1e-05, %v462_v57 }
 0x130   : > { %982 = vrsqrt.f32 %v464_v58 }
 0x13a   : > { %v983_v63 = vpop.eup %982 }
 0x13b   : > { %v466_v0 = vmul.f32 %v983_v63, %v463_v61 }
 0x13d   : > { %v468_v2 = vmul.f32 %v466_v0, %v453_v48  ;;  %v474_v3 = vrot.slane %v466_v0, %v473_v62 }
 0x13f   : > { %v469_v4 = vsub.f32 %v467_v1, %v468_v2  ;;  %v476_v5 = vmul.f32 %v474_v3, %v441_v38 }
 0x141   : > { %v481_v6 = vrot.slane %v469_v4, %v473_v62 }
 0x143   : > { %v483_v7 = vadd.f32 %v481_v6, %v476_v5 }
 0x145   : > { %v484_v8 = vmul.f32 0.01, %v483_v7 }
 0x147   : > { %v485_v9 = vmax.f32 %v483_v7, %v484_v8 }
 0x149   : > { %v486_v10 = vpack.c.bf16 %v485_v9, %v485_v9 }
 0x14b   : > { %487 = vst [vmem:[#allocation2] sm:$0xf] %v486_v10 }
 0x14c PF: > { %v984_v11 = vld [vmem:[%s1277_s13 + $0x4] ss:$16 sps:$4 sm:$0xff]   ;;  %v986_v12 = vld [vmem:[%s1277_s13 + $0xc] ss:$16 sps:$4 sm:$0xff]   ;;  %v1098_v13 = vmov 0   ;;  %v523_v45 = vlaneseq  ;;  %s804_s18 = sshll.u32 %s1279_s14, 4  ;;  %s1341_s18 = int_to_ptr.vmem [resolvable:$true] %s804_s18 }
 0x14d   : > { %735 = vmatprep.mubr.bf16.mxu0 %v1098_v13  ;;  %776 = vmatprep.mubr.bf16.mxu1 %v1098_v13  ;;  %v988_v14 = vld [vmem:[%s1277_s13] ss:$16 sps:$4 sm:$0xff]   ;;  %v989_v15 = vld [vmem:[%s1277_s13 + $0x8] ss:$16 sps:$4 sm:$0xff]   ;;  %v990_v16 = vld [vmem:[%s1277_s13 + $0x24] ss:$16 sps:$4 sm:$0xff]  }
 0x14e   : > { %703 = vmatprep.subr.bf16.mxu0 %v984_v11  ;;  %744 = vmatprep.subr.bf16.mxu1 %v986_v12  ;;  %v992_v17 = vld [vmem:[%s1277_s13 + $0x2c] ss:$16 sps:$4 sm:$0xff]   ;;  %v994_v18 = vld [vmem:[%s1277_s13 + $0x20] ss:$16 sps:$4 sm:$0xff]   ;;  %v995_v19 = vld [vmem:[%s1277_s13 + $0x28] ss:$16 sps:$4 sm:$0xff]  }
 0x14f   : > { %704 = vmatpush1.bf16.msra.mxu0 %v988_v14  ;;  %745 = vmatpush1.bf16.msra.mxu1 %v989_v15  ;;  %v996_v20 = vld [vmem:[%s1277_s13 + $0x44] ss:$16 sps:$4 sm:$0xff]   ;;  %v998_v21 = vld [vmem:[%s1277_s13 + $0x4c] ss:$16 sps:$4 sm:$0xff]   ;;  %v1000_v22 = vld [vmem:[%s1277_s13 + $0x40] ss:$16 sps:$4 sm:$0xff]  }
 0x150   : > { %705 = vmatprep.subr.bf16.mxu0 %v990_v16  ;;  %746 = vmatprep.subr.bf16.mxu1 %v992_v17  ;;  %v1001_v23 = vld [vmem:[%s1277_s13 + $0x48] ss:$16 sps:$4 sm:$0xff]   ;;  %v1002_v24 = vld [vmem:[%s1277_s13 + $0x64] ss:$16 sps:$4 sm:$0xff]   ;;  %v1004_v25 = vld [vmem:[%s1277_s13 + $0x6c] ss:$16 sps:$4 sm:$0xff]  }
 0x151   : > { %v1006_v26 = vld [vmem:[%s1277_s13 + $0x60] ss:$16 sps:$4 sm:$0xff]   ;;  %v1007_v27 = vld [vmem:[%s1277_s13 + $0x68] ss:$16 sps:$4 sm:$0xff]   ;;  %v1008_v28 = vld [vmem:[%s1277_s13 + $0x84] ss:$16 sps:$4 sm:$0xff]  }
 0x152   : > { %v1010_v29 = vld [vmem:[%s1277_s13 + $0x8c] ss:$16 sps:$4 sm:$0xff]   ;;  %v1012_v30 = vld [vmem:[%s1277_s13 + $0x80] ss:$16 sps:$4 sm:$0xff]   ;;  %v1013_v31 = vld [vmem:[%s1277_s13 + $0x88] ss:$16 sps:$4 sm:$0xff]  }
 0x153   : > { %706 = vmatpush1.bf16.msra.mxu0 %v994_v18  ;;  %747 = vmatpush1.bf16.msra.mxu1 %v995_v19  ;;  %v1014_v32 = vld [vmem:[%s1277_s13 + $0xa4] ss:$16 sps:$4 sm:$0xff]   ;;  %v1016_v33 = vld [vmem:[%s1277_s13 + $0xac] ss:$16 sps:$4 sm:$0xff]   ;;  %v1018_v34 = vld [vmem:[%s1277_s13 + $0xa0] ss:$16 sps:$4 sm:$0xff]  }
 0x154   : > { %707 = vmatprep.subr.bf16.mxu0 %v996_v20  ;;  %748 = vmatprep.subr.bf16.mxu1 %v998_v21  ;;  %v1019_v35 = vld [vmem:[%s1277_s13 + $0xa8] ss:$16 sps:$4 sm:$0xff]   ;;  %v1020_v36 = vld [vmem:[%s1277_s13 + $0xc4] ss:$16 sps:$4 sm:$0xff]   ;;  %v1022_v37 = vld [vmem:[%s1277_s13 + $0xcc] ss:$16 sps:$4 sm:$0xff]  }
 0x155   : > { %v1024_v38 = vld [vmem:[%s1277_s13 + $0xc0] ss:$16 sps:$4 sm:$0xff]   ;;  %v1025_v39 = vld [vmem:[%s1277_s13 + $0xc8] ss:$16 sps:$4 sm:$0xff]   ;;  %v1026_v40 = vld [vmem:[%s1277_s13 + $0xe4] ss:$16 sps:$4 sm:$0xff]  }
 0x156   : > { %v1028_v41 = vld [vmem:[%s1277_s13 + $0xec] ss:$16 sps:$4 sm:$0xff]   ;;  %v1030_v42 = vld [vmem:[%s1277_s13 + $0xe0] ss:$16 sps:$4 sm:$0xff]   ;;  %v1031_v43 = vld [vmem:[%s1277_s13 + $0xe8] ss:$16 sps:$4 sm:$0xff]  }
 0x157   : > { %708 = vmatpush1.bf16.msra.mxu0 %v1000_v22  ;;  %749 = vmatpush1.bf16.msra.mxu1 %v1001_v23  ;;  %v488_v44 = vld [vmem:[#allocation2] sm:$0xf]  ;;  %v524_v46 = vshrl.u32 %v523_v45, 7  ;;  %s930_s13 = sshll.u32 %s1161_s28, 9  ;;  %s790_s28 = scalar_lea.sflag [#allocation5], %s1266_s20 }
 0x158   : > { %709 = vmatprep.subr.bf16.mxu0 %v1002_v24  ;;  %750 = vmatprep.subr.bf16.mxu1 %v1004_v25  ;;  %v521_v49 = vld [vmem:[%s377_s9] sm:$0xf]  ;;  %s1339_s19 = scalar_lea.hbm %s1394_s7, %s930_s13  ;;  %s1032_s22 = scalar_lea.vmem %s1341_s18, 512 }
 0x159   : > { %v525_v47 = vsub.s32 0, %v524_v46  ;;  %v533_v48 = vsub.s32 2, %v524_v46  ;;  %v529_v50 = vsub.s32 1, %v524_v46  ;;  %v537_v51 = vsub.s32 3, %v524_v46  ;;  %p1033_p1 = scmp.ne.s32.totalorder %s1341_s18, %s1032_s22  ;;  %s1099_s23 = smov [#allocation4]  }
 0x15a   : > { %s1036_s29 = sshll.u32 %s1099_s23, 4  ;;  %s1037_s29 = int_to_ptr.vmem [resolvable:$false] %s1036_s29 }
 0x15b   : > { %710 = vmatpush1.bf16.msra.mxu0 %v1006_v26  ;;  %751 = vmatpush1.bf16.msra.mxu1 %v1007_v27  ;;  %v526_v52 = vrot.slane %v521_v49, %v525_v47  ;;  %v534_v53 = vrot.slane %v521_v49, %v533_v48  ;;  %v530_v54 = vrot.slane %v521_v49, %v529_v50  ;;  %p1034_p2 = pnand %p1033_p1, %p1179_p6  ;;  %s1038_s8 = scalar_lea.vmem %s1037_s29, 1024 }
 0x15c   : > { %711 = vmatprep.subr.bf16.mxu0 %v1008_v28  ;;  %752 = vmatprep.subr.bf16.mxu1 %v1010_v29  ;;  %v538_v55 = vrot.slane %v521_v49, %v537_v51  ;;  %p1039_p4 = scmp.lt.s32.totalorder %s1341_s18, %s1037_s29  ;;  %p1040_p5 = scmp.lt.s32.totalorder %s1038_s8, %s1032_s22 }
 0x15d   : > { %p1035_p3 = pneg %p1034_p2 }
 0x15e   : > { %p1041_p7 = por %p1040_p5, %p1039_p4 }
 0x15f   : > { %712 = vmatpush1.bf16.msra.mxu0 %v1012_v30  ;;  %753 = vmatpush1.bf16.msra.mxu1 %v1013_v31 }
 0x160   : > { %713 = vmatprep.subr.bf16.mxu0 %v1014_v32  ;;  %754 = vmatprep.subr.bf16.mxu1 %v1016_v33  ;;  %p1042_p10 = pnand %p1041_p7, %p1035_p3 }
 0x163   : > { %714 = vmatpush1.bf16.msra.mxu0 %v1018_v34  ;;  %755 = vmatpush1.bf16.msra.mxu1 %v1019_v35 }
 0x164   : > { %715 = vmatprep.subr.bf16.mxu0 %v1020_v36  ;;  %756 = vmatprep.subr.bf16.mxu1 %v1022_v37 }
 0x167   : > { %716 = vmatpush1.bf16.msra.mxu0 %v1024_v38  ;;  %757 = vmatpush1.bf16.msra.mxu1 %v1025_v39 }
 0x168   : > { %717 = vmatprep.subr.bf16.mxu0 %v1026_v40  ;;  %758 = vmatprep.subr.bf16.mxu1 %v1028_v41 }
 0x16b   : > { %718 = vmatpush1.bf16.msra.mxu0 %v1030_v42  ;;  %759 = vmatpush1.bf16.msra.mxu1 %v1031_v43 }
 0x16e   : > { %736 = vmatmul.mubr.bf16.vlgmr.msra.gmra.mrb[0].mxu0 %v488_v44  ;;  %777 = vmatmul.mubr.bf16.vlgmr.msra.gmra.mrb[0].mxu1 %v488_v44 }
 0x241   : > { %v737_v56 = vpop.f32.mrb[0].mxu0  ;;  %v778_v57 = vpop.f32.mrb[0].mxu1 }
 0x242   : > { %v738_v58 = vadd.f32 %v737_v56, %v526_v52  ;;  %v779_v59 = vadd.f32 %v778_v57, %v534_v53  ;;  %v739_v60 = vpop.f32.mrb[1].mxu0  ;;  %v780_v61 = vpop.f32.mrb[1].mxu1 }
 0x243   : > { %v740_v62 = vadd.f32 %v739_v60, %v530_v54  ;;  %v781_v63 = vadd.f32 %v780_v61, %v538_v55  ;;  %v741_v0 = vpop.f32.mrb[2].mxu0  ;;  %v782_v1 = vpop.f32.mrb[2].mxu1 }
 0x244   : > { %785 = vst [vmem:[%s1279_s14] sm:$0xff] %v738_v58  ;;  %787 = vst [vmem:[%s1279_s14 + $0x10] sm:$0xff] %v779_v59  ;;  %v742_v2 = vpop.f32.mrb[3].mxu0  ;;  %v783_v3 = vpop.f32.mrb[3].mxu1 }
 0x245   : > { %786 = vst [vmem:[%s1279_s14 + $0x8] sm:$0xff] %v740_v62  ;;  %788 = vst [vmem:[%s1279_s14 + $0x18] sm:$0xff] %v781_v63 }
 0x246   : > { %1045 = shalt.err (!%p1042_p10)
}
 0x247   : > { %s1046_s20 = scalar_lea.hbm %s1339_s19, 512  ;;  %s1050_s16 = scalar_lea.hbm %s1394_s7, 1024 }
 0x248   : > { %p1047_p11 = scmp.ne.s32.totalorder %s1339_s19, %s1046_s20  ;;  %p1051_p0 = scmp.lt.u32.totalorder %s1339_s19, %s1394_s7 }
 0x249   : > { %p1052_p1 = scmp.lt.u32.totalorder %s1050_s16, %s1046_s20  ;;  %p1054_p3 = scmp.lt.u32.totalorder %s1046_s20, %s1339_s19 }
 0x24a   : > { %p1048_p12 = pnand %p1047_p11, %p1179_p6 }
 0x24b   : > { %p1053_p2 = por %p1052_p1, %p1051_p0 }
 0x24c   : > { %p1049_p13 = pneg %p1048_p12 }
 0x24d   : > { %p1055_p4 = por %p1054_p3, %p1053_p2 }
 0x24f   : > { %p1056_p5 = pnand %p1055_p4, %p1049_p13 }
 0x251   : > { %1059 = shalt.err (!%p1056_p5)
}
 0x252   : > { %939 = dma.vmem_to_hbm [thread:$0]  (%p1179_p6), %s1341_s18, 512, %s1339_s19, %s790_s28  }
 0x253 PF: > { %s816_s21 = sand.u32 1, %s1082_s24   ;;  %p942_p7 = pnand %p880_p9, %p1183_p8 }
 0x254   : > { %s817_s9 = scalar_lea.sflag [#allocation5], %s816_s21 }
 0x255   : > { %1077 = dma.done.wait (!%p942_p7), %s817_s9, 512  }
 0x256   : > { %1079 = vsyncadd (!%p942_p7), %s817_s9, 4294966784  ;;  %p17_p10 = scmp.ge.s32.totalorder %s1165_s30, 4   ;;  %s1397_s24 = smov %s1086_s25 }
 0x257   : > { %s1398_s25 = smov %s1090_s26  ;;  %s1399_s26 = smov %s1177_s10 }
 0x258   : > { %s1400_s27 = smov %s1165_s30  ;;  %19 = sbr.rel (!%p17_p10) target bundleno = 3 (0x3), region = 118 }
 0x25f   :  { %822 = vsyncpa [#allocation5], 1 }
 0x260   :  { %824 = vsyncpa [#allocation5 + $0x1], 1 }

</bundles_post_ra>
